<compile_context>
chip_gen: v6e
topology: v6e:2x2x1
jax: 0.10.0
libtpu: 0.0.40
codegen_flags: <defaults>
</compile_context>

<pallas_src>
import functools

import jax
import jax.numpy as jnp
from jax.experimental import pallas as pl
from jax.experimental.pallas import tpu as pltpu


# ---------------------------------------------------------------------------
# Kernel
# ---------------------------------------------------------------------------
def _tipinn_mlp_kernel(xT_ref, w1_ref, b1_ref, w2_ref, b2_ref,
                       w3_ref, b3_ref, wo_ref, bo_ref, oT_ref):
    """Fused MLP forward on one transposed batch tile.

    xT_ref : [in_dim,  block_b]   (batch on lanes)
    w*_ref : [out, in]            (PyTorch Linear layout, stationary LHS)
    b*_ref : [out, 1]             (broadcasts across batch lanes)
    oT_ref : [out_dim, block_b]
    """
    # Single live activation `h` keeps vreg pressure low (strictly sequential
    # chain, no extra temporaries kept alive).
    h = xT_ref[...]

    h = jnp.maximum(
        jnp.dot(w1_ref[...], h, preferred_element_type=jnp.float32) + b1_ref[...],
        0.0)
    h = jnp.maximum(
        jnp.dot(w2_ref[...], h, preferred_element_type=jnp.float32) + b2_ref[...],
        0.0)
    h = jnp.maximum(
        jnp.dot(w3_ref[...], h, preferred_element_type=jnp.float32) + b3_ref[...],
        0.0)
    out = jnp.dot(wo_ref[...], h, preferred_element_type=jnp.float32) + bo_ref[...]

    oT_ref[...] = out.astype(oT_ref.dtype)


# ---------------------------------------------------------------------------
# Wrapper
# ---------------------------------------------------------------------------
def _round_up(x, m):
    return ((x + m - 1) // m) * m


def _choose_block_b(B):
    """Lane-dense batch tile (multiple of 128); prefer >= 2 grid steps so the
    v7x megacore can shard the parallel axis; cap at 2048 rows to stay well
    inside the default scoped-VMEM budget with double buffering."""
    Bp = _round_up(B, 128)
    if Bp <= 128:
        return 128
    half = _round_up(-(-Bp // 2), 128)          # ceil(Bp/2) rounded to 128
    return min(half, 2048)


@functools.partial(jax.jit, static_argnames=("block_b",))
def _tipinn_forward_pallas(x, params, block_b):
    B, in_dim = x.shape
    hid = params["w1"].shape[0]
    out_dim = params["wo"].shape[0]

    B_pad = _round_up(B, block_b)
    grid = (B_pad // block_b,)

    # Batch-on-lanes layout (pad batch to a tile multiple; no-op if aligned).
    xT = jnp.pad(x, ((0, B_pad - B), (0, 0))).T          # [in_dim, B_pad]

    x_spec = pl.BlockSpec((in_dim, block_b), lambda i: (0, i))
    o_spec = pl.BlockSpec((out_dim, block_b), lambda i: (0, i))

    def full_spec(shape):
        # Constant block index -> fetched once, resident in VMEM across steps.
        return pl.BlockSpec(shape, lambda i: (0, 0))

    in_specs = [
        x_spec,
        full_spec((hid, in_dim)),  full_spec((hid, 1)),
        full_spec((hid, hid)),     full_spec((hid, 1)),
        full_spec((hid, hid)),     full_spec((hid, 1)),
        full_spec((out_dim, hid)), full_spec((out_dim, 1)),
    ]

    flops = 2 * B_pad * (in_dim * hid + 2 * hid * hid + hid * out_dim)
    weight_bytes = 4 * (hid * in_dim + 2 * hid * hid + out_dim * hid
                        + 3 * hid + out_dim)
    bytes_accessed = 4 * B_pad * (in_dim + out_dim) + weight_bytes

    oT = pl.pallas_call(
        _tipinn_mlp_kernel,
        out_shape=jax.ShapeDtypeStruct((out_dim, B_pad), x.dtype),
        grid=grid,
        in_specs=in_specs,
        out_specs=o_spec,
        compiler_params=pltpu.CompilerParams(
            dimension_semantics=("parallel",)),
        cost_estimate=pl.CostEstimate(
            flops=flops, transcendentals=0, bytes_accessed=bytes_accessed),
    )(xT, params["w1"], params["b1"], params["w2"], params["b2"],
      params["w3"], params["b3"], params["wo"], params["bo"])

    return oT.T[:B, :]                                    # back to [B, out_dim]


def tipinn_forward(x, params, *, block_b=None):
    """Pallas forward pass. x: [B, input_dim] f32; params in PyTorch layout."""
    if block_b is None:
        block_b = _choose_block_b(x.shape[0])
    return _tipinn_forward_pallas(x, params, block_b)


def tipinn_apply(x, params):
    """Dispatch: tiny batches go to plain XLA (kernel overhead dominates)."""
    if x.shape[0] < 128:
        return tipinn_forward_ref(x, params)
    return tipinn_forward(x, params)


# ---------------------------------------------------------------------------
# Params + reference
# ---------------------------------------------------------------------------
def init_tipinn_params(key, input_dim, hidden_dim, output_dim):
    """Deterministic init, PyTorch-Linear-like fan_in bound.

    Weights stored in PyTorch layout [out, in]; biases as [out, 1] columns.
    """
    keys = jax.random.split(key, 8)

    def linear(kw, kb, fan_in, fan_out):
        bound = 1.0 / jnp.sqrt(float(fan_in))
        w = jax.random.uniform(kw, (fan_out, fan_in), jnp.float32, -bound, bound)
        b = jax.random.uniform(kb, (fan_out, 1), jnp.float32, -bound, bound)
        return w, b

    w1, b1 = linear(keys[0], keys[1], input_dim, hidden_dim)
    w2, b2 = linear(keys[2], keys[3], hidden_dim, hidden_dim)
    w3, b3 = linear(keys[4], keys[5], hidden_dim, hidden_dim)
    wo, bo = linear(keys[6], keys[7], hidden_dim, output_dim)
    return dict(w1=w1, b1=b1, w2=w2, b2=b2, w3=w3, b3=b3, wo=wo, bo=bo)


def tipinn_forward_ref(x, p):
    """Pure-JAX reference (same math as the PyTorch module's forward)."""
    h = jnp.maximum(x @ p["w1"].T + p["b1"].T, 0.0)
    h = jnp.maximum(h @ p["w2"].T + p["b2"].T, 0.0)
    h = jnp.maximum(h @ p["w3"].T + p["b3"].T, 0.0)
    return h @ p["wo"].T + p["bo"].T


# ---------------------------------------------------------------------------
# Demo / correctness check
# ---------------------------------------------------------------------------
if __name__ == "__main__":
    key = jax.random.PRNGKey(0)
    k_param, k_x = jax.random.split(key)

    # Module-consistent shapes; batch=256 gives 2 lane-dense tiles of 128
    # (exercises the parallel grid axis, incl. both v7x TensorCores).
    batch, input_dim, hidden_dim, output_dim = 256, 4, 32, 1

    params = init_tipinn_params(k_param, input_dim, hidden_dim, output_dim)
    x = jax.random.normal(k_x, (batch, input_dim), dtype=jnp.float32)

    out = tipinn_forward(x, params)
    out = jax.block_until_ready(out)

    ref = tipinn_forward_ref(x, params)
    assert out.shape == (batch, output_dim)
    assert jnp.allclose(out, ref, atol=1e-5, rtol=1e-5), "mismatch vs reference"

    print("KERNEL_OK")
</pallas_src>

<mosaic_0001>
module attributes {stable_mosaic.version = 11 : i64} {
  func.func @_tipinn_mlp_kernel(%arg0: i32, %arg1: memref<4x128xf32, #tpu.memory_space<vmem>>, %arg2: memref<32x4xf32, #tpu.memory_space<vmem>>, %arg3: memref<32x1xf32, #tpu.memory_space<vmem>>, %arg4: memref<32x32xf32, #tpu.memory_space<vmem>>, %arg5: memref<32x1xf32, #tpu.memory_space<vmem>>, %arg6: memref<32x32xf32, #tpu.memory_space<vmem>>, %arg7: memref<32x1xf32, #tpu.memory_space<vmem>>, %arg8: memref<1x32xf32, #tpu.memory_space<vmem>>, %arg9: memref<1x1xf32, #tpu.memory_space<vmem>>, %arg10: memref<1x128xf32, #tpu.memory_space<vmem>>) attributes {dimension_semantics = [#tpu.dimension_semantics<parallel>], iteration_bounds = array<i64: 2>, scalar_prefetch = 0 : i64, scratch_operands = 0 : i64, tpu.core_type = #tpu.core_type<tc>, window_params = [{transform_indices = @transform_0, window_bounds = array<i64: 4, 128>}, {pipeline_mode = #tpu.pipeline_mode<synchronous>, transform_indices = @transform_1, window_bounds = array<i64: 32, 4>}, {pipeline_mode = #tpu.pipeline_mode<synchronous>, transform_indices = @transform_2, window_bounds = array<i64: 32, 1>}, {pipeline_mode = #tpu.pipeline_mode<synchronous>, transform_indices = @transform_3, window_bounds = array<i64: 32, 32>}, {pipeline_mode = #tpu.pipeline_mode<synchronous>, transform_indices = @transform_4, window_bounds = array<i64: 32, 1>}, {pipeline_mode = #tpu.pipeline_mode<synchronous>, transform_indices = @transform_5, window_bounds = array<i64: 32, 32>}, {pipeline_mode = #tpu.pipeline_mode<synchronous>, transform_indices = @transform_6, window_bounds = array<i64: 32, 1>}, {pipeline_mode = #tpu.pipeline_mode<synchronous>, transform_indices = @transform_7, window_bounds = array<i64: 1, 32>}, {pipeline_mode = #tpu.pipeline_mode<synchronous>, transform_indices = @transform_8, window_bounds = array<i64: 1, 1>}, {transform_indices = @transform_9, window_bounds = array<i64: 1, 128>}]} {
    %c0 = arith.constant 0 : index
    %c0_0 = arith.constant 0 : index
    %0 = vector.load %arg1[%c0, %c0_0] : memref<4x128xf32, #tpu.memory_space<vmem>>, vector<4x128xf32>
    %c0_1 = arith.constant 0 : index
    %c0_2 = arith.constant 0 : index
    %1 = vector.load %arg2[%c0_1, %c0_2] : memref<32x4xf32, #tpu.memory_space<vmem>>, vector<32x4xf32>
    %cst = arith.constant dense<0.000000e+00> : vector<32x128xf32>
    %2 = tpu.matmul %1, %0, %cst {dimension_numbers = #tpu.dot_dimension_numbers<[1], [0], [0], [1], [0, 0, 1, 1], [], []>} : vector<32x4xf32>, vector<4x128xf32>, vector<32x128xf32> -> vector<32x128xf32>
    %c0_3 = arith.constant 0 : index
    %c0_4 = arith.constant 0 : index
    %3 = vector.load %arg3[%c0_3, %c0_4] : memref<32x1xf32, #tpu.memory_space<vmem>>, vector<32x1xf32>
    %4 = vector.broadcast %3 : vector<32x1xf32> to vector<32x128xf32>
    %5 = arith.addf %2, %4 : vector<32x128xf32>
    %cst_5 = arith.constant 0.000000e+00 : f32
    %6 = vector.broadcast %cst_5 : f32 to vector<32x128xf32>
    %7 = arith.maximumf %5, %6 : vector<32x128xf32>
    %c0_6 = arith.constant 0 : index
    %c0_7 = arith.constant 0 : index
    %8 = vector.load %arg4[%c0_6, %c0_7] : memref<32x32xf32, #tpu.memory_space<vmem>>, vector<32x32xf32>
    %cst_8 = arith.constant dense<0.000000e+00> : vector<32x128xf32>
    %9 = tpu.matmul %8, %7, %cst_8 {dimension_numbers = #tpu.dot_dimension_numbers<[1], [0], [0], [1], [0, 0, 1, 1], [], []>} : vector<32x32xf32>, vector<32x128xf32>, vector<32x128xf32> -> vector<32x128xf32>
    %c0_9 = arith.constant 0 : index
    %c0_10 = arith.constant 0 : index
    %10 = vector.load %arg5[%c0_9, %c0_10] : memref<32x1xf32, #tpu.memory_space<vmem>>, vector<32x1xf32>
    %11 = vector.broadcast %10 : vector<32x1xf32> to vector<32x128xf32>
    %12 = arith.addf %9, %11 : vector<32x128xf32>
    %cst_11 = arith.constant 0.000000e+00 : f32
    %13 = vector.broadcast %cst_11 : f32 to vector<32x128xf32>
    %14 = arith.maximumf %12, %13 : vector<32x128xf32>
    %c0_12 = arith.constant 0 : index
    %c0_13 = arith.constant 0 : index
    %15 = vector.load %arg6[%c0_12, %c0_13] : memref<32x32xf32, #tpu.memory_space<vmem>>, vector<32x32xf32>
    %cst_14 = arith.constant dense<0.000000e+00> : vector<32x128xf32>
    %16 = tpu.matmul %15, %14, %cst_14 {dimension_numbers = #tpu.dot_dimension_numbers<[1], [0], [0], [1], [0, 0, 1, 1], [], []>} : vector<32x32xf32>, vector<32x128xf32>, vector<32x128xf32> -> vector<32x128xf32>
    %c0_15 = arith.constant 0 : index
    %c0_16 = arith.constant 0 : index
    %17 = vector.load %arg7[%c0_15, %c0_16] : memref<32x1xf32, #tpu.memory_space<vmem>>, vector<32x1xf32>
    %18 = vector.broadcast %17 : vector<32x1xf32> to vector<32x128xf32>
    %19 = arith.addf %16, %18 : vector<32x128xf32>
    %cst_17 = arith.constant 0.000000e+00 : f32
    %20 = vector.broadcast %cst_17 : f32 to vector<32x128xf32>
    %21 = arith.maximumf %19, %20 : vector<32x128xf32>
    %c0_18 = arith.constant 0 : index
    %c0_19 = arith.constant 0 : index
    %22 = vector.load %arg8[%c0_18, %c0_19] : memref<1x32xf32, #tpu.memory_space<vmem>>, vector<1x32xf32>
    %cst_20 = arith.constant dense<0.000000e+00> : vector<1x128xf32>
    %23 = tpu.matmul %22, %21, %cst_20 {dimension_numbers = #tpu.dot_dimension_numbers<[1], [0], [0], [1], [0, 0, 1, 1], [], []>} : vector<1x32xf32>, vector<32x128xf32>, vector<1x128xf32> -> vector<1x128xf32>
    %c0_21 = arith.constant 0 : index
    %c0_22 = arith.constant 0 : index
    %24 = vector.load %arg9[%c0_21, %c0_22] : memref<1x1xf32, #tpu.memory_space<vmem>>, vector<1x1xf32>
    %25 = vector.broadcast %24 : vector<1x1xf32> to vector<1x128xf32>
    %26 = arith.addf %23, %25 : vector<1x128xf32>
    %c0_23 = arith.constant 0 : index
    %c0_24 = arith.constant 0 : index
    %27 = vector.load %arg10[%c0_23, %c0_24] : memref<1x128xf32, #tpu.memory_space<vmem>>, vector<1x128xf32>
    tpu.vector_store %arg10[%c0_23, %c0_24], %26 {strides = array<i32>} : memref<1x128xf32, #tpu.memory_space<vmem>>, vector<1x128xf32>,
    return
  }
  func.func @transform_0(%arg0: i32) -> (i32, i32) {
    %c0_i32 = arith.constant 0 : i32
    %c0_i32_0 = arith.constant 0 : i32
    return %c0_i32, %arg0 : i32, i32
  }
  func.func @transform_1(%arg0: i32) -> (i32, i32) {
    %c0_i32 = arith.constant 0 : i32
    %c0_i32_0 = arith.constant 0 : i32
    %c0_i32_1 = arith.constant 0 : i32
    return %c0_i32, %c0_i32_0 : i32, i32
  }
  func.func @transform_2(%arg0: i32) -> (i32, i32) {
    %c0_i32 = arith.constant 0 : i32
    %c0_i32_0 = arith.constant 0 : i32
    %c0_i32_1 = arith.constant 0 : i32
    return %c0_i32, %c0_i32_0 : i32, i32
  }
  func.func @transform_3(%arg0: i32) -> (i32, i32) {
    %c0_i32 = arith.constant 0 : i32
    %c0_i32_0 = arith.constant 0 : i32
    %c0_i32_1 = arith.constant 0 : i32
    return %c0_i32, %c0_i32_0 : i32, i32
  }
  func.func @transform_4(%arg0: i32) -> (i32, i32) {
    %c0_i32 = arith.constant 0 : i32
    %c0_i32_0 = arith.constant 0 : i32
    %c0_i32_1 = arith.constant 0 : i32
    return %c0_i32, %c0_i32_0 : i32, i32
  }
  func.func @transform_5(%arg0: i32) -> (i32, i32) {
    %c0_i32 = arith.constant 0 : i32
    %c0_i32_0 = arith.constant 0 : i32
    %c0_i32_1 = arith.constant 0 : i32
    return %c0_i32, %c0_i32_0 : i32, i32
  }
  func.func @transform_6(%arg0: i32) -> (i32, i32) {
    %c0_i32 = arith.constant 0 : i32
    %c0_i32_0 = arith.constant 0 : i32
    %c0_i32_1 = arith.constant 0 : i32
    return %c0_i32, %c0_i32_0 : i32, i32
  }
  func.func @transform_7(%arg0: i32) -> (i32, i32) {
    %c0_i32 = arith.constant 0 : i32
    %c0_i32_0 = arith.constant 0 : i32
    %c0_i32_1 = arith.constant 0 : i32
    return %c0_i32, %c0_i32_0 : i32, i32
  }
  func.func @transform_8(%arg0: i32) -> (i32, i32) {
    %c0_i32 = arith.constant 0 : i32
    %c0_i32_0 = arith.constant 0 : i32
    %c0_i32_1 = arith.constant 0 : i32
    return %c0_i32, %c0_i32_0 : i32, i32
  }
  func.func @transform_9(%arg0: i32) -> (i32, i32) {
    %c0_i32 = arith.constant 0 : i32
    %c0_i32_0 = arith.constant 0 : i32
    return %c0_i32, %arg0 : i32, i32
  }
}

</mosaic_0001>

<bundles_post_ra>
// kernel: _tipinn_forward_pallas.1
= control target key start
LH: loop header
LB: loop body
LE: loop exit
PB: predicated region body
PF: predicated region fallthrough
CT: control target
= control target key end

     0   :  { %s1315_s0 = inlined_call_operand.vmem [shape: f32[4,256], index: 0, kind: input, shape index: {}]   ;;  %s1316_s1 = inlined_call_operand.vmem [shape: f32[32,4], index: 1, kind: input, shape index: {}]   ;;  %s1317_s2 = inlined_call_operand.vmem [shape: f32[32,1], index: 2, kind: input, shape index: {}]   ;;  %s1318_s3 = inlined_call_operand.vmem [shape: f32[32,32], index: 3, kind: input, shape index: {}]   ;;  %s1319_s4 = inlined_call_operand.vmem [shape: f32[32,1], index: 4, kind: input, shape index: {}]   ;;  %s1320_s5 = inlined_call_operand.vmem [shape: f32[32,32], index: 5, kind: input, shape index: {}]   ;;  %s1321_s6 = inlined_call_operand.vmem [shape: f32[32,1], index: 6, kind: input, shape index: {}]   ;;  %s1322_s7 = inlined_call_operand.vmem [shape: f32[1,32], index: 7, kind: input, shape index: {}]   ;;  %s1323_s8 = inlined_call_operand.<no memory space> [shape: f32[1,1], index: 8, kind: input, shape index: {}]   ;;  %s1324_s9 = inlined_call_operand.hbm [shape: f32[1,256], index: 9, kind: output, shape index: {}]  }
   0x1   :  { %v14_v0 = vstv %s1323_s8 }
   0x2   :  { %15 = vst [vmem:[#allocation2] sm:$0x1] %v14_v0 }
   0x3   :  { %16 = vsyncpa [#allocation4], 0 }
   0x4   :  { %18 = vsyncpa [#allocation4 + $0x1], 0  ;;  %s1134_s11 = smov 0   ;;  %s1136_s12 = smov 0  }
   0x5   :  { %s1138_s13 = smov 0   ;;  %s1140_s14 = smov 0  }
   0x6 LB: > { %s1155_s8 = sadd.s32 4294967295, %s1075_s14   ;;  %s876_s15 = sadd.s32 4294967294, %s1075_s14   ;;  %s1075_s14 = sphi %s1140_s14, %s1330_s14   ;;  %s1071_s13 = sphi %s1138_s13, %s1329_s13   ;;  %s1067_s12 = sphi %s1136_s12, %s1328_s12   ;;  %s1063_s11 = sphi %s1134_s11, %s1327_s11  }
   0x7   : > { %s1159_s16 = sadd.s32 1, %s1075_s14   ;;  %s225_s17 = sadd.s32 1, %s1071_s13 }
   0x8   : > { %s222_s18 = ssub.s32 %s1075_s14, %s1159_s16  ;;  %p235_p0 = scmp.ne.s32.totalorder %s1071_s13, %s1067_s12 }
   0x9   : > { %p223_p1 = scmp.eq.s32.totalorder %s222_s18, 0  ;;  %p236_p2 = scmp.eq.s32.totalorder %s1155_s8, 1 }
   0xa   : > { %p241_p3 = scmp.ne.s32.totalorder %s1067_s12, %s1063_s11  ;;  %p242_p4 = scmp.eq.s32.totalorder %s876_s15, 1 }
   0xb   : > { %s1170_s19 = scalar_select %p223_p1, %s1071_s13, %s225_s17  }
   0xc   : > { %p1172_p5 = por %p236_p2, %p235_p0  ;;  %p1176_p6 = por %p242_p4, %p241_p3 }
   0xd   : > { %p879_p7 = scmp.ge.s32.totalorder %s1075_s14, 1  ;;  %p291_p8 = scmp.lt.s32.totalorder %s1075_s14, 3 }
   0xf   : > { %p292_p9 = pnand %p879_p7, %p291_p8 }
  0x10   : > { %p325_p10 = scmp.lt.s32.totalorder (!%p292_p9), %s1155_s8, 1  ;;  %s323_s25 = sand.u32 (!%p292_p9), 1, %s1067_s12  }
  0x11   : > { %295 = sbr.rel (%p292_p9) target bundleno = 863 (0x35f), region = 56  ;;  %s324_s27 = scalar_lea.vmem (!%p292_p9), [#allocation3], %s323_s25 }
  0x12   : > { %s821_s28 = sshll.u32 (!%p292_p9), %s324_s27, 4  ;;  %s809_s15 = scalar_lea.sflag (!%p292_p9), [#allocation4], %s323_s25  ;;  %s822_s28 = int_to_ptr.vmem [resolvable:$true] %s821_s28 }
  0x13   : > { %s1015_s17 = scalar_lea.vmem (!%p292_p9), %s822_s28, 16 }
  0x14   : > { %p1016_p11 = scmp.ne.s32.totalorder (!%p292_p9), %s822_s28, %s1015_s17 }
  0x16   : > { %v330_v1 = vld [vmem:[%s1316_s1] sm:$0xff]  ;;  %vm358_vm0 = vcmask 31744   ;;  %v337_v2 = vld [vmem:[%s1317_s2 + $0x18] sm:$0xff]  ;;  %s326_s26 = scalar_select %p325_p10, %s1155_s8, 1  ;;  %v1077_v3 = vmov 0   ;;  %v335_v4 = vld [vmem:[%s1317_s2 + $0x8] sm:$0xff] }
  0x17   : > { %926 = vmatprep.mubr.msk.f32.mxu0 %vm358_vm0, %v330_v1  ;;  %1013 = vset.pattern.permute.xlu0 %v1077_v3  ;;  %vm371_vm1 = vcmask 1043456   ;;  %v336_v5 = vld [vmem:[%s1317_s2 + $0x10] sm:$0xff]  ;;  %v334_v6 = vld [vmem:[%s1317_s2] sm:$0xff]  ;;  %v331_v8 = vld [vmem:[%s1316_s1 + $0x8] sm:$0xff]  ;;  %vm492_vm2 = vcmask 261120   ;;  %v1078_v60 = vmov 0.0   ;;  %p1017_p12 = pnand %p1016_p11, %p1172_p5 }
  0x18   : > { %1014 = vset.pattern.permute.xlu1 %v1077_v3  ;;  %355 = vperm.xlu0 %1013, %v337_v2   ;;  %s880_s29 = sshll.u32 %s326_s26, 2  ;;  %v332_v9 = vld [vmem:[%s1316_s1 + $0x10] sm:$0xff]  ;;  %v471_v10 = vld [vmem:[%s1319_s4 + $0x18] sm:$0xff]  ;;  %v469_v13 = vld [vmem:[%s1319_s4 + $0x8] sm:$0xff]  ;;  %vm1079_vm3 = vmmov 0   ;;  %s895_s26 = sshll.u32 %s1155_s8, 4 }
  0x19   : > { %345 = vperm.xlu1 %1014, %v335_v4   ;;  %s328_s18 = scalar_lea.vmem %s1315_s0, %s880_s29  ;;  %v470_v11 = vld [vmem:[%s1319_s4 + $0x10] sm:$0xff]  ;;  %v333_v12 = vld [vmem:[%s1316_s1 + $0x18] sm:$0xff]  ;;  %v468_v14 = vld [vmem:[%s1319_s4] sm:$0xff]  ;;  %s1280_s10 = scalar_lea.hbm %s1324_s9, %s895_s26 }
  0x1a   : > { %v329_v7 = vld [vmem:[%s328_s18] sm:$0xf]  ;;  %v601_v15 = vld [vmem:[%s1321_s6 + $0x18] sm:$0xff]  ;;  %v600_v16 = vld [vmem:[%s1321_s6 + $0x10] sm:$0xff]  ;;  %p1018_p13 = pneg %p1017_p12  ;;  %s1080_s8 = smov [#allocation3]  }
  0x1b   : > { %924 = vmatprep.subr.msk.mxu0 %vm371_vm1, %v329_v7  ;;  %v599_v17 = vld [vmem:[%s1321_s6 + $0x8] sm:$0xff]  ;;  %v598_v18 = vld [vmem:[%s1321_s6] sm:$0xff]  ;;  %v466_v38 = vld [vmem:[%s1318_s3 + $0x10] sm:$0xff]  ;;  %s1019_s18 = sshll.u32 %s1080_s8, 4  ;;  %s1020_s18 = int_to_ptr.vmem [resolvable:$false] %s1019_s18 }
  0x1c   : > { %350 = vperm.xlu0 %1013, %v336_v5   ;;  %925 = vmatpush3.msk.msra.mxu0 %vm371_vm1, %v329_v7  ;;  %v724_v19 = vld [vmem:[#allocation2] sm:$0x1]  ;;  %v465_v37 = vld [vmem:[%s1318_s3 + $0x8] sm:$0xff]  ;;  %v467_v39 = vld [vmem:[%s1318_s3 + $0x18] sm:$0xff]  ;;  %s1021_s22 = scalar_lea.vmem %s1020_s18, 32  ;;  %p1022_p0 = scmp.lt.s32.totalorder %s822_s28, %s1020_s18 }
  0x1d   : > { %340 = vperm.xlu1 %1014, %v334_v6   ;;  %927 = vmatmul.mubr.msk.f32.vlgmr.msra.gmra.mxu0 %vm358_vm0, %v331_v8  ;;  %v464_v20 = vld [vmem:[%s1318_s3] sm:$0xff]  ;;  %v595_v57 = vld [vmem:[%s1320_s5 + $0x8] sm:$0xff]  ;;  %v596_v58 = vld [vmem:[%s1320_s5 + $0x10] sm:$0xff]  ;;  %p1023_p1 = scmp.lt.s32.totalorder %s1021_s22, %s1015_s17 }
  0x1e   : > { %929 = vmatprep.mubr.msk.f32.mxu0 %vm358_vm0, %v332_v9  ;;  %940 = vmatprep.mubr.msk.f32.mxu1 %vm492_vm2, %v464_v20  ;;  %v594_v40 = vld [vmem:[%s1320_s5] sm:$0xff]  ;;  %v597_v59 = vld [vmem:[%s1320_s5 + $0x18] sm:$0xff] }
  0x1f   : > { %p1024_p2 = por %p1023_p1, %p1022_p0 }
  0x20   : > { %489 = vperm.xlu0 %1013, %v471_v10  }
  0x21   : > { %484 = vperm.xlu1 %1014, %v470_v11   ;;  %930 = vmatmul.mubr.msk.f32.gmra.mxu0 %vm358_vm0, %v333_v12  ;;  %p1025_p3 = pnand %p1024_p2, %p1018_p13 }
  0x22   : > { %954 = vmatprep.mubr.msk.f32.mxu0 %vm492_vm2, %v594_v40 }
  0x24   : > { %479 = vperm.xlu0 %1013, %v469_v13   ;;  %v723_v13 = vld [vmem:[%s1322_s7] sm:$0x1] }
  0x25   : > { %474 = vperm.xlu1 %1014, %v468_v14   ;;  %v730_v14 = vlaneseq }
  0x28   : > { %619 = vperm.xlu0 %1013, %v601_v15   ;;  %v731_v15 = vshrl.u32 %v730_v14, 7 }
  0x29   : > { %614 = vperm.xlu1 %1014, %v600_v16  }
  0x2a   : > { %v732_v16 = vsub.s32 0, %v731_v15 }
  0x2c   : > { %609 = vperm.xlu0 %1013, %v599_v17  }
  0x2d   : > { %604 = vperm.xlu1 %1014, %v598_v18  }
  0x30   : > { %727 = vperm.xlu0 %1013, %v724_v19  }
  0x93   : > { %v356_v21 = vpop.permute.xlu0 %355 }
  0x94   : > { %v346_v23 = vpop.permute.xlu1 %345 }
  0x97   : > { %v351_v27 = vpop.permute.xlu0 %350 }
  0x98   : > { %v341_v32 = vpop.permute.xlu1 %340 }
  0x9b   : > { %v490_v41 = vpop.permute.xlu0 %489 }
  0x9c   : > { %v485_v43 = vpop.permute.xlu1 %484 }
  0x9f   : > { %v480_v47 = vpop.permute.xlu0 %479 }
  0xa0   : > { %v475_v52 = vpop.permute.xlu1 %474 }
  0xa3   : > { %v620_v61 = vpop.permute.xlu0 %619 }
  0xa4   : > { %v615_v63 = vpop.permute.xlu1 %614 }
  0xa7   : > { %v610_v3 = vpop.permute.xlu0 %609 }
  0xa8   : > { %v605_v8 = vpop.permute.xlu1 %604 }
  0xab   : > { %v728_v17 = vpop.permute.xlu0 %727 }
  0xac   : > { %v733_v18 = vrot.slane %v728_v17, %v732_v16 }
  0xdd   : > { %v928_v22 = vpop.f32.mrf.mxu0 }
  0xde   : > { %v447_v29 = vadd.f32 %v928_v22, %v346_v23 }
  0xdf   : > { %v441_v24 = vpop.f32.mrf.mxu0 }
  0xe0   : > { %v442_v33 = vadd.f32 %v441_v24, %v341_v32  ;;  %v461_v35 = vmax.f32 %v447_v29, 0.0 }
  0xe1   : > { %v931_v25 = vpop.f32.mrf.mxu0 }
  0xe2   : > { %v457_v26 = vadd.f32 %v931_v25, %v356_v21  ;;  %v460_v36 = vmax.f32 %v442_v33, 0.0 }
  0xe3   : > { %v451_v28 = vpop.f32.mrf.mxu0 }
  0xe4   : > { %v463_v30 = vmax.f32 %v457_v26, 0.0  ;;  %v452_v31 = vadd.f32 %v451_v28, %v351_v27 }
  0xe6   : > { %v462_v34 = vmax.f32 %v452_v31, 0.0  ;;  %932 = vmatprep.subr.mxu1 %v463_v30 }
  0xe7   : > { %933 = vmatpush3.msra.mxu1 %v463_v30 }
  0xe8   : > { %934 = vmatprep.subr.mxu1 %v462_v34 }
  0xe9   : > { %935 = vmatpush3.msra.mxu1 %v462_v34 }
  0xea   : > { %936 = vmatprep.subr.mxu1 %v461_v35 }
  0xeb   : > { %937 = vmatpush3.msra.mxu1 %v461_v35 }
  0xec   : > { %938 = vmatprep.subr.mxu1 %v460_v36 }
  0xed   : > { %939 = vmatpush3.msra.mxu1 %v460_v36 }
  0xee   : > { %941 = vmatmul.mubr.msk.f32.vlgmr.msra.gmra.mxu1 %vm492_vm2, %v465_v37  ;;  %960 = vmatprep.subr.mxu1 %v1078_v60 }
  0xef   : > { %943 = vmatprep.mubr.msk.f32.mxu1 %vm492_vm2, %v466_v38 }
  0xf2   : > { %944 = vmatmul.mubr.msk.f32.gmra.mxu1 %vm492_vm2, %v467_v39 }
  0xf3   : > { %968 = vmatprep.mubr.msk.f32.mxu1 %vm1079_vm3, %v1078_v60 }
 0x1ae   : > { %v942_v42 = vpop.f32.mrf.mxu1 }
 0x1af   : > { %v577_v49 = vadd.f32 %v942_v42, %v480_v47 }
 0x1b0   : > { %v571_v44 = vpop.f32.mrf.mxu1 }
 0x1b1   : > { %v572_v53 = vadd.f32 %v571_v44, %v475_v52  ;;  %v591_v55 = vmax.f32 %v577_v49, 0.0 }
 0x1b2   : > { %v945_v45 = vpop.f32.mrf.mxu1 }
 0x1b3   : > { %v587_v46 = vadd.f32 %v945_v45, %v490_v41  ;;  %v590_v56 = vmax.f32 %v572_v53, 0.0 }
 0x1b4   : > { %v581_v48 = vpop.f32.mrf.mxu1 }
 0x1b5   : > { %v593_v50 = vmax.f32 %v587_v46, 0.0  ;;  %v582_v51 = vadd.f32 %v581_v48, %v485_v43 }
 0x1b7   : > { %v592_v54 = vmax.f32 %v582_v51, 0.0  ;;  %946 = vmatprep.subr.mxu0 %v593_v50 }
 0x1b8   : > { %947 = vmatpush3.msra.mxu0 %v593_v50 }
 0x1b9   : > { %948 = vmatprep.subr.mxu0 %v592_v54 }
 0x1ba   : > { %949 = vmatpush3.msra.mxu0 %v592_v54 }
 0x1bb   : > { %950 = vmatprep.subr.mxu0 %v591_v55 }
 0x1bc   : > { %951 = vmatpush3.msra.mxu0 %v591_v55 }
 0x1bd   : > { %952 = vmatprep.subr.mxu0 %v590_v56 }
 0x1be   : > { %953 = vmatpush3.msra.mxu0 %v590_v56 }
 0x1bf   : > { %955 = vmatmul.mubr.msk.f32.vlgmr.msra.gmra.mxu0 %vm492_vm2, %v595_v57 }
 0x1c0   : > { %957 = vmatprep.mubr.msk.f32.mxu0 %vm492_vm2, %v596_v58 }
 0x1c3   : > { %958 = vmatmul.mubr.msk.f32.gmra.mxu0 %vm492_vm2, %v597_v59 }
 0x27f   : > { %v956_v62 = vpop.f32.mrf.mxu0 }
 0x280   : > { %v706_v5 = vadd.f32 %v956_v62, %v610_v3 }
 0x281   : > { %v700_v0 = vpop.f32.mrf.mxu0 }
 0x282   : > { %v701_v9 = vadd.f32 %v700_v0, %v605_v8  ;;  %v720_v11 = vmax.f32 %v706_v5, 0.0 }
 0x283   : > { %v959_v1 = vpop.f32.mrf.mxu0 }
 0x284   : > { %v716_v2 = vadd.f32 %v959_v1, %v620_v61  ;;  %v719_v12 = vmax.f32 %v701_v9, 0.0 }
 0x285   : > { %v710_v4 = vpop.f32.mrf.mxu0 }
 0x286   : > { %v722_v6 = vmax.f32 %v716_v2, 0.0  ;;  %v711_v7 = vadd.f32 %v710_v4, %v615_v63 }
 0x288   : > { %v721_v10 = vmax.f32 %v711_v7, 0.0  ;;  %961 = vmatpush3.msra.mxu1 %v722_v6 }
 0x289   : > { %962 = vmatprep.subr.mxu1 %v1078_v60 }
 0x28a   : > { %963 = vmatpush3.msra.mxu1 %v721_v10 }
 0x28b   : > { %964 = vmatprep.subr.mxu1 %v1078_v60 }
 0x28c   : > { %965 = vmatpush3.msra.mxu1 %v720_v11 }
 0x28d   : > { %966 = vmatprep.subr.mxu1 %v1078_v60 }
 0x28e   : > { %967 = vmatpush3.msra.mxu1 %v719_v12 }
 0x28f   : > { %969 = vmatmul.mubr.msk.f32.vlgmr.msra.gmra.mxu1 %vm492_vm2, %v723_v13 }
 0x34f   : > { %v803_v19 = vpop.f32.mrf.mxu1 }
 0x350   : > { %v804_v20 = vadd.f32 %v803_v19, %v733_v18 }
 0x351   : > { %v970_v21 = vpop.f32.mrf.mxu1 }
 0x352   : > { %807 = vst [vmem:[%s324_s27] sm:$0x1] %v804_v20 }
 0x353   : > { %1028 = shalt.err (!%p1025_p3)
}
 0x354   : > { %s1029_s23 = scalar_lea.hbm %s1280_s10, 16  ;;  %s1033_s26 = scalar_lea.hbm %s1324_s9, 32 }
 0x355   : > { %p1030_p4 = scmp.ne.s32.totalorder %s1280_s10, %s1029_s23  ;;  %p1034_p9 = scmp.lt.s32.totalorder %s1280_s10, %s1324_s9 }
 0x356   : > { %p1035_p10 = scmp.lt.s32.totalorder %s1033_s26, %s1029_s23 }
 0x357   : > { %p1031_p7 = pnand %p1030_p4, %p1172_p5 }
 0x358   : > { %p1036_p11 = por %p1035_p10, %p1034_p9 }
 0x359   : > { %p1032_p8 = pneg %p1031_p7 }
 0x35b   : > { %p1037_p12 = pnand %p1036_p11, %p1032_p8 }
 0x35d   : > { %1040 = shalt.err (!%p1037_p12)
}
 0x35e   : > { %971 = dma.vmem_to_hbm [thread:$0]  (%p1172_p5), %s822_s28, 16, %s1280_s10, %s809_s15  }
 0x35f PF: > { %p977_p13 = scmp.ge.s32.totalorder %s1075_s14, 2  ;;  %s833_s29 = sand.u32 1, %s1063_s11  }
 0x360   : > { %s834_s17 = scalar_lea.sflag [#allocation4], %s833_s29 }
 0x361   : > { %p974_p0 = pnand %p977_p13, %p1176_p6 }
 0x363   : > { %p975_p1 = pneg %p974_p0 }
 0x365   : > { %1058 = dma.done.wait (%p975_p1), %s834_s17, 16  }
 0x366   : > { %1060 = vsyncadd (%p975_p1), %s834_s17, 4294967280  ;;  %p21_p2 = scmp.ge.s32.totalorder %s1159_s16, 4   ;;  %s1327_s11 = smov %s1067_s12 }
 0x367   : > { %s1328_s12 = smov %s1071_s13  ;;  %s1329_s13 = smov %s1170_s19 }
 0x368   : > { %s1330_s14 = smov %s1159_s16  ;;  %23 = sbr.rel (!%p21_p2) target bundleno = 6 (0x6), region = 91 }
 0x36d   :  { %838 = vsyncpa [#allocation4], 1 }
 0x36e   :  { %840 = vsyncpa [#allocation4 + $0x1], 1 }

</bundles_post_ra>
